<compile_context>
chip_gen: v7x
topology: tpu7x:2x2x1
jax: 0.10.0
libtpu: 0.0.40
codegen_flags: <defaults>
</compile_context>

<pallas_src>
import jax
import jax.numpy as jnp
from jax.experimental import pallas as pl
from jax.experimental.pallas import tpu as pltpu


def _expmap_kernel(u_ref, s_ref, o_ref):
    """o[t] = (U_t * exp(s_t)) @ U_t^T for all TM matrices in the block."""
    u = u_ref[0]                              # (TM, N, N)
    s = s_ref[0]                              # (TM, N)
    x = u * jnp.exp(s)[:, None, :]            # U @ diag(exp s): scale columns
    # Batched (t,i,k) x (t,j,k) -> (t,i,j); contracting on the last dims means
    # the "U^T" operand never has to be materialized.
    o_ref[0] = jnp.einsum("tik,tjk->tij", x, u,
                          preferred_element_type=jnp.float32)


@jax.jit
def spd_exp_map(x):
    """x: (..., N, N) symmetric matrices, float32. Returns exp map, same shape."""
    orig_shape = x.shape
    N = orig_shape[-1]
    M = 1
    for d in orig_shape[:-2]:
        M *= d
    xf = x.reshape(M, N, N)

    # TODO(synk): torch.linalg.eigh has no Pallas equivalent; stays in XLA.
    s, u = jnp.linalg.eigh(xf)                # (M, N), (M, N, N)

    # ---- choose per-step batch TM: amortize grid overhead, keep grid >= 2 ---
    TM_TARGET = 64
    if M >= 2 * TM_TARGET:
        TM = TM_TARGET
    else:
        TM = max(1, M // 2)                   # grid >= 2 whenever M >= 2 (v7x)
    G = pl.cdiv(M, TM)
    Mp = G * TM
    if Mp != M:                               # pad with zeros (harmless, sliced off)
        u = jnp.concatenate([u, jnp.zeros((Mp - M, N, N), u.dtype)], axis=0)
        s = jnp.concatenate([s, jnp.zeros((Mp - M, N), s.dtype)], axis=0)

    ur = u.reshape(G, TM, N, N)
    sr = s.reshape(G, TM, N)

    cost = pl.CostEstimate(
        flops=2 * Mp * N * N * N + Mp * N * N,
        transcendentals=Mp * N,
        bytes_accessed=4 * (Mp * N * N + Mp * N + Mp * N * N),
    )

    out = pl.pallas_call(
        _expmap_kernel,
        out_shape=jax.ShapeDtypeStruct((G, TM, N, N), jnp.float32),
        grid_spec=pltpu.PrefetchScalarGridSpec(
            num_scalar_prefetch=0,
            grid=(G,),
            in_specs=[
                pl.BlockSpec((1, TM, N, N), lambda g: (g, 0, 0, 0)),
                pl.BlockSpec((1, TM, N), lambda g: (g, 0, 0)),
            ],
            out_specs=pl.BlockSpec((1, TM, N, N), lambda g: (g, 0, 0, 0)),
        ),
        compiler_params=pltpu.CompilerParams(
            dimension_semantics=("parallel",)),
        cost_estimate=cost,
    )(ur, sr)

    out = out.reshape(Mp, N, N)[:M]
    return out.reshape(orig_shape)


# ---------------------------------------------------------------------------
# Pure-JAX reference (same math, no Pallas) for a sanity check.
# ---------------------------------------------------------------------------
def _reference(x):
    s, u = jnp.linalg.eigh(x)
    return (u * jnp.exp(s)[..., None, :]) @ jnp.swapaxes(u, -1, -2)


if __name__ == "__main__":
    B, C, N = 2, 4, 16
    key = jax.random.PRNGKey(0)
    a = jax.random.normal(key, (B, C, N, N), dtype=jnp.float32)
    # Symmetric (tangent-space) inputs with modest eigenvalues.
    x = 0.25 * (a + jnp.swapaxes(a, -1, -2))

    out = jax.block_until_ready(spd_exp_map(x))
    ref = _reference(x)

    assert out.shape == (B, C, N, N)
    assert jnp.allclose(out, ref, rtol=1e-3, atol=1e-3), "mismatch vs reference"

    print("KERNEL_OK")
</pallas_src>

<mosaic_0001>
module attributes {stable_mosaic.version = 11 : i64} {
  func.func @_expmap_kernel(%arg0: i32, %arg1: memref<1x4x16x16xf32, #tpu.memory_space<vmem>>, %arg2: memref<1x4x16xf32, #tpu.memory_space<vmem>>, %arg3: memref<1x4x16x16xf32, #tpu.memory_space<vmem>>) attributes {dimension_semantics = [#tpu.dimension_semantics<parallel>], iteration_bounds = array<i64: 2>, scalar_prefetch = 0 : i64, scratch_operands = 0 : i64, tpu.core_type = #tpu.core_type<tc>, window_params = [{transform_indices = @transform_0, window_bounds = array<i64: 1, 4, 16, 16>}, {transform_indices = @transform_1, window_bounds = array<i64: 1, 4, 16>}, {transform_indices = @transform_2, window_bounds = array<i64: 1, 4, 16, 16>}]} {
    %c0 = arith.constant 0 : index
    %c0_0 = arith.constant 0 : index
    %c0_1 = arith.constant 0 : index
    %c0_2 = arith.constant 0 : index
    %0 = vector.load %arg1[%c0, %c0_0, %c0_1, %c0_2] : memref<1x4x16x16xf32, #tpu.memory_space<vmem>>, vector<1x4x16x16xf32>
    %1 = vector.shape_cast %0 : vector<1x4x16x16xf32> to vector<4x16x16xf32>
    %c0_3 = arith.constant 0 : index
    %c0_4 = arith.constant 0 : index
    %c0_5 = arith.constant 0 : index
    %2 = vector.load %arg2[%c0_3, %c0_4, %c0_5] : memref<1x4x16xf32, #tpu.memory_space<vmem>>, vector<1x4x16xf32>
    %3 = vector.shape_cast %2 : vector<1x4x16xf32> to vector<4x16xf32>
    %4 = math.exp %3 : vector<4x16xf32>
    %5 = vector.shape_cast %4 : vector<4x16xf32> to vector<4x1x16xf32>
    %6 = vector.broadcast %5 : vector<4x1x16xf32> to vector<4x16x16xf32>
    %7 = arith.mulf %1, %6 : vector<4x16x16xf32>
    "tpu.trace_start"() <{level = 10 : i32, message = "tik,tjk->tij"}> : () -> ()
    %cst = arith.constant dense<0.000000e+00> : vector<4x16x16xf32>
    %8 = tpu.matmul %7, %1, %cst {dimension_numbers = #tpu.dot_dimension_numbers<[2], [2], [1], [1], [0, 0, 0, 1, 1, 1], [0], [0]>} : vector<4x16x16xf32>, vector<4x16x16xf32>, vector<4x16x16xf32> -> vector<4x16x16xf32>
    "tpu.trace_stop"() : () -> ()
    %c0_6 = arith.constant 0 : index
    %c0_7 = arith.constant 0 : index
    %c0_8 = arith.constant 0 : index
    %c0_9 = arith.constant 0 : index
    %9 = vector.load %arg3[%c0_6, %c0_7, %c0_8, %c0_9] : memref<1x4x16x16xf32, #tpu.memory_space<vmem>>, vector<1x4x16x16xf32>
    %10 = vector.shape_cast %9 : vector<1x4x16x16xf32> to vector<4x16x16xf32>
    %11 = vector.shape_cast %8 : vector<4x16x16xf32> to vector<1x4x16x16xf32>
    tpu.vector_store %arg3[%c0_6, %c0_7, %c0_8, %c0_9], %11 {strides = array<i32>} : memref<1x4x16x16xf32, #tpu.memory_space<vmem>>, vector<1x4x16x16xf32>,
    return
  }
  func.func @transform_0(%arg0: i32) -> (i32, i32, i32, i32) {
    %c0_i32 = arith.constant 0 : i32
    %c0_i32_0 = arith.constant 0 : i32
    %c0_i32_1 = arith.constant 0 : i32
    %c0_i32_2 = arith.constant 0 : i32
    return %arg0, %c0_i32, %c0_i32_0, %c0_i32_1 : i32, i32, i32, i32
  }
  func.func @transform_1(%arg0: i32) -> (i32, i32, i32) {
    %c0_i32 = arith.constant 0 : i32
    %c0_i32_0 = arith.constant 0 : i32
    %c0_i32_1 = arith.constant 0 : i32
    return %arg0, %c0_i32, %c0_i32_0 : i32, i32, i32
  }
  func.func @transform_2(%arg0: i32) -> (i32, i32, i32, i32) {
    %c0_i32 = arith.constant 0 : i32
    %c0_i32_0 = arith.constant 0 : i32
    %c0_i32_1 = arith.constant 0 : i32
    %c0_i32_2 = arith.constant 0 : i32
    return %arg0, %c0_i32, %c0_i32_0, %c0_i32_1 : i32, i32, i32, i32
  }
}

</mosaic_0001>

<bundles_post_ra>
// kernel: custom-call.2
= control target key start
LH: loop header
LB: loop body
LE: loop exit
PB: predicated region body
PF: predicated region fallthrough
CT: control target
= control target key end

     0   :  { %s1662_s30 = smov 0   ;;  %s1664_s10 = smov 0   ;;  %s1971_s0 = inlined_call_operand.vmem [shape: f32[8,8,8], index: 0, kind: input, shape index: {}]   ;;  %s1972_s1 = inlined_call_operand.vmem [shape: f32[8,8,8], index: 1, kind: input, shape index: {}]   ;;  %s1973_s2 = inlined_call_operand.vmem [shape: f32[8,8,8], index: 2, kind: input, shape index: {}]   ;;  %s1974_s3 = inlined_call_operand.vmem [shape: f32[8,8,8], index: 3, kind: input, shape index: {}]   ;;  %s1975_s4 = inlined_call_operand.vmem [shape: f32[8,8], index: 4, kind: output, shape index: {0}]   ;;  %s1976_s5 = inlined_call_operand.vmem [shape: f32[8,8], index: 5, kind: output, shape index: {1}]   ;;  %s1977_s6 = inlined_call_operand.vmem [shape: f32[8,8,8], index: 6, kind: output, shape index: {2}]   ;;  %s1978_s7 = inlined_call_operand.vmem [shape: f32[8,8,8], index: 7, kind: output, shape index: {3}]   ;;  %s1979_s8 = inlined_call_operand.vmem [shape: f32[8,8,8], index: 8, kind: output, shape index: {4}]   ;;  %s1980_s9 = inlined_call_operand.vmem [shape: f32[8,8,8], index: 9, kind: output, shape index: {5}]  }
   0x1   :  { %s1666_s11 = smov 0  }
   0x2 LB: > { %s1678_s12 = sadd.s32 4294967295, %s1599_s11   ;;  %s1681_s13 = sadd.s32 1, %s1599_s11   ;;  %s1599_s11 = sphi %s1666_s11, %s1989_s11   ;;  %s1595_s10 = sphi %s1664_s10, %s1988_s10   ;;  %s1591_s30 = sphi %s1662_s30, %s1987_s30  }
   0x3   : > { %s20_s14 = sshrl.u32 %s1599_s11, 3  ;;  %s21_s15 = sshrl.u32 %s1681_s13, 3 }
   0x4   : > { %s22_s16 = ssub.s32 %s20_s14, %s21_s15  ;;  %s25_s17 = sadd.s32 1, %s1595_s10 }
   0x5   : > { %p23_p0 = scmp.eq.s32.totalorder %s22_s16, 0  ;;  %p35_p1 = scmp.ne.s32.totalorder %s1595_s10, %s1591_s30 }
   0x6   : > { %p36_p2 = scmp.eq.s32.totalorder %s1678_s12, 7  ;;  %p1460_p4 = scmp.ge.s32.totalorder %s1599_s11, 8 }
   0x7   : > { %s1690_s18 = scalar_select %p23_p0, %s1595_s10, %s25_s17  }
   0x8   : > { %p1692_p3 = por %p36_p2, %p35_p1  ;;  %86 = sbr.rel (%p1460_p4) target bundleno = 17 (0x11), region = 16 }
   0x9   : > { %1981 = sst [smem:[#allocation23_spill]] %s1690_s18  ;;  %s88_s20 = sand.u32 (!%p1460_p4), 1, %s1599_s11  }
   0xa   : > { %s1462_s21 = sshll.u32 (!%p1460_p4), %s1599_s11, 3  ;;  %s1461_s22 = sshll.u32 (!%p1460_p4), %s88_s20, 3 }
   0xb   : > { %s92_s25 = scalar_lea.vmem (!%p1460_p4), %s1971_s0, %s1462_s21  ;;  %s90_s26 = scalar_lea.vmem (!%p1460_p4), [#allocation0], %s1461_s22 }
   0xc   : > { %v120_v0 = vld [vmem:[%s92_s25] sm:$0xff] (!%p1460_p4)  ;;  %s130_s29 = scalar_lea.vmem (!%p1460_p4), %s1972_s1, %s1462_s21  ;;  %s168_s16 = scalar_lea.vmem (!%p1460_p4), %s1973_s2, %s1462_s21 }
   0xd   : > { %121 = vst [vmem:[%s90_s26] sm:$0xff] (!%p1460_p4), %v120_v0  ;;  %v158_v1 = vld [vmem:[%s130_s29] sm:$0xff] (!%p1460_p4)  ;;  %s128_s17 = scalar_lea.vmem (!%p1460_p4), [#allocation1], %s1461_s22  ;;  %s206_s23 = scalar_lea.vmem (!%p1460_p4), %s1974_s3, %s1462_s21 }
   0xe   : > { %159 = vst [vmem:[%s128_s17] sm:$0xff] (!%p1460_p4), %v158_v1  ;;  %v196_v2 = vld [vmem:[%s168_s16] sm:$0xff] (!%p1460_p4)  ;;  %s166_s24 = scalar_lea.vmem (!%p1460_p4), [#allocation2], %s1461_s22  ;;  %s204_s25 = scalar_lea.vmem (!%p1460_p4), [#allocation3], %s1461_s22 }
   0xf   : > { %197 = vst [vmem:[%s166_s24] sm:$0xff] %v196_v2  ;;  %v234_v3 = vld [vmem:[%s206_s23] sm:$0xff] }
  0x10   : > { %235 = vst [vmem:[%s204_s25] sm:$0xff] %v234_v3 }
  0x11 PF: > { %p1469_p5 = scmp.ge.s32.totalorder %s1599_s11, 1  ;;  %p240_p6 = scmp.lt.s32.totalorder %s1599_s11, 9 }
  0x13   : > { %p241_p7 = pnand %p1469_p5, %p240_p6 }
  0x15   : > { %244 = sbr.rel (%p241_p7) target bundleno = 984 (0x3d8), region = 156 }
  0x1c   : > { %s247_s26 = sand.u32 1, %s1678_s12   ;;  %s281_s27 = sand.u32 1, %s1591_s30   ;;  %v325_v4 = vlaneseq  ;;  %v1609_v11 = vmov 0.0  }
  0x1d   : > { %s1470_s28 = sshll.u32 %s247_s26, 3  ;;  %s1715_s18 = sshll.u32 %s281_s27, 3 }
  0x1e   : > { %v1717_v5 = vand.u32 127, %v325_v4  ;;  %v1719_v6 = vshrl.u32 %v325_v4, 7  ;;  %s249_s21 = scalar_lea.vmem [#allocation0], %s1470_s28  ;;  %s253_s22 = scalar_lea.vmem [#allocation1], %s1470_s28 }
  0x1f   : > { %v309_v7 = vld [vmem:[%s249_s21] sm:$0xff]  ;;  %v312_v8 = vld [vmem:[%s253_s22] sm:$0xff]  ;;  %s257_s29 = scalar_lea.vmem [#allocation2], %s1470_s28  ;;  %s261_s11 = scalar_lea.vmem [#allocation3], %s1470_s28 }
  0x20   : > { %v315_v9 = vld [vmem:[%s257_s29] sm:$0xff]  ;;  %v318_v10 = vld [vmem:[%s261_s11] sm:$0xff]  ;;  %s1721_s14 = scalar_lea.vmem [#allocation6], %s1470_s28  ;;  %s1724_s30 = scalar_lea.vmem [#allocation7], %s1470_s28  ;;  %v327_v5 = vmov %v1717_v5  ;;  %v330_v6 = vmov %v1719_v6  ;;  %vm1349_vm2 = vcmp.lt.s32.totalorder %v1717_v5, 8 }
  0x21   : > { %320 = vst [vmem:[%s1721_s14] sm:$0xff] %v1609_v11  ;;  %321 = vst [vmem:[%s1724_s30] sm:$0xff] %v1609_v11  ;;  %s308_s15 = smov [#allocation10]  ;;  %s311_s16 = smov [#allocation11]  ;;  %v340_v5 = vmov %v1717_v5  ;;  %v343_v6 = vmov %v1719_v6  ;;  %vm334_vm0 = vcmp.eq.s32.totalorder %v330_v6, %v327_v5 }
  0x22   : > { %s1727_s17 = scalar_lea.vmem [#allocation8], %s1470_s28  ;;  %s1730_s20 = scalar_lea.vmem [#allocation9], %s1470_s28  ;;  %310 = vst [vmem:[%s308_s15] sm:$0xff] %v309_v7  ;;  %313 = vst [vmem:[%s311_s16] sm:$0xff] %v312_v8  ;;  %vm347_vm1 = vcmp.eq.s32.totalorder %v343_v6, %v340_v5  ;;  %v1341_v5 = vmov %v1717_v5  ;;  %v1344_v6 = vmov %v1719_v6 }
  0x23   : > { %322 = vst [vmem:[%s1727_s17] sm:$0xff] %v1609_v11  ;;  %323 = vst [vmem:[%s1730_s20] sm:$0xff] %v1609_v11  ;;  %s314_s23 = smov [#allocation12]  ;;  %s317_s24 = smov [#allocation13]  ;;  %vm1354_vm3 = vcmp.eq.s32.totalorder %v1344_v6, %v1341_v5  ;;  %v1392_v5 = vmov %v1717_v5  ;;  %v1361_v6 = vmov %v1719_v6 }
  0x24   : > { %316 = vst [vmem:[%s314_s23] sm:$0xff] %v315_v9  ;;  %319 = vst [vmem:[%s317_s24] sm:$0xff] %v318_v10  ;;  %s324_s14 = smov %s1721_s14  ;;  %s337_s20 = smov %s1730_s20  ;;  %v1358_v5 = vmov %v1717_v5  ;;  %v1395_v6 = vmov %v1719_v6 }
  0x25   : > { %s283_s25 = scalar_lea.vmem [#allocation4], %s1715_s18  ;;  %s1345_s27 = smov [#allocation10]  ;;  %v1375_v5 = vmov %v1717_v5  ;;  %v1378_v6 = vmov %v1719_v6  ;;  %vm1405_vm4 = vcmp.eq.s32.totalorder %v1395_v6, %v1392_v5 }
  0x26   : > { %s1362_s28 = smov [#allocation11]  ;;  %s1379_s21 = smov [#allocation12] }
  0x27   : > { %s1396_s22 = smov [#allocation13] }
  0x28   : > { %v331_v12 = vld [vmem:[%s324_s14] sm:$0xff] }
  0x29   : > { %v335_v13 = vsel %vm334_vm0, 1.0, %v331_v12  ;;  %v1351_v16 = vld [vmem:[%s1345_s27] sm:$0xff] }
  0x2a   : > { %v344_v14 = vld [vmem:[%s337_s20] sm:$0xff]  ;;  %336 = vst [vmem:[%s324_s14] sm:$0xff] %v335_v13  ;;  %v1352_v18 = vsel %vm1349_vm2, %v1351_v16, 0.0 }
  0x2b   : > { %v348_v15 = vsel %vm347_vm1, 1.0, %v344_v14  ;;  %v1368_v17 = vld [vmem:[%s1362_s28] sm:$0xff]  ;;  %v1353_v22 = vmul.f32 %v1352_v18, %v1352_v18 }
  0x2c   : > { %349 = vst [vmem:[%s337_s20] sm:$0xff] %v348_v15  ;;  %v1369_v19 = vsel %vm1349_vm2, %v1368_v17, 0.0  ;;  %v1385_v20 = vld [vmem:[%s1379_s21] sm:$0xff] }
  0x2d   : > { %v1402_v21 = vld [vmem:[%s1396_s22] sm:$0xff]  ;;  %v1370_v23 = vmul.f32 %v1369_v19, %v1369_v19  ;;  %v1386_v24 = vsel %vm1349_vm2, %v1385_v20, 0.0  ;;  %v1355_v29 = vsel %vm1354_vm3, 0.0, %v1353_v22 }
  0x2e   : > { %v1403_v25 = vsel %vm1349_vm2, %v1402_v21, 0.0  ;;  %v1387_v26 = vmul.f32 %v1386_v24, %v1386_v24 }
  0x2f   : > { %v1372_v27 = vadd.f32 %v1370_v23, %v1353_v22  ;;  %v1404_v28 = vmul.f32 %v1403_v25, %v1403_v25  ;;  %v1371_v30 = vadd.f32 %v1370_v23, %v1355_v29 }
  0x31   : > { %v1389_v31 = vadd.f32 %v1387_v26, %v1372_v27  ;;  %v1388_v32 = vadd.f32 %v1387_v26, %v1371_v30  ;;  %v1406_v33 = vsel %vm1405_vm4, 0.0, %v1404_v28 }
  0x33   : > { %v1408_v34 = vadd.f32 %v1404_v28, %v1389_v31  ;;  %v1407_v35 = vadd.f32 %v1406_v33, %v1388_v32 }
  0x35   : > { %1409 = vadd.xlane.f32.xlu0 %v1408_v34 }
  0x39   : > { %1417 = vadd.xlane.f32.xlu0 %v1407_v35 }
  0xc2   : > { %v1410_v36 = vpop.xlane.xlu0 %1409 }
  0xc3   : > { %v1411_v37 = vrot.slane %v1410_v36, 4 }
  0xc5   : > { %v1412_v38 = vadd.f32 %v1411_v37, %v1410_v36 }
  0xc6   : > { %v1418_v39 = vpop.xlane.xlu0 %1417 }
  0xc7   : > { %v1413_v40 = vrot.slane %v1412_v38, 2  ;;  %v1419_v41 = vrot.slane %v1418_v39, 4 }
  0xc9   : > { %v1420_v42 = vadd.f32 %v1419_v41, %v1418_v39  ;;  %v1414_v43 = vadd.f32 %v1413_v40, %v1412_v38 }
  0xcb   : > { %v1421_v44 = vrot.slane %v1420_v42, 2  ;;  %v1415_v46 = vrot.slane %v1414_v43, 1 }
  0xcd   : > { %v1422_v45 = vadd.f32 %v1421_v44, %v1420_v42  ;;  %v1416_v49 = vadd.f32 %v1415_v46, %v1414_v43 }
  0xcf   : > { %v1423_v47 = vrot.slane %v1422_v45, 1 }
  0xd1   : > { %v1424_v48 = vadd.f32 %v1423_v47, %v1422_v45 }
  0xd3   : > { %1510 = vpush %v1424_v48 }
  0xd4   : > { %1512 = vpush %v1416_v49 }
 0x104   : > { %s1511_s29 = spop %1510 }
 0x105   : > { %s1513_s11 = spop %1512 }
 0x106   : > { %s1427_s15 = smul.f32 1e-10, %s1513_s11 }
 0x108   : > { %p1428_p8 = scmp.le.f32.partialorder %s1511_s29, %s1427_s15 }
 0x109   : > { %s1759_s16 = smov (!%p1428_p8), 0  }
 0x10a   : > { %1431 = sbr.rel (%p1428_p8) target bundleno = 948 (0x3b4), region = 507 }
 0x111 LB: >> { %s1764_s23 = smov 0   ;;  %s1603_s16 = sphi %s1759_s16, %s1983_s16  }
 0x112 LB: >>> { %s454_s24 = smov [#allocation10]  ;;  %v458_v5 = vmov %v1717_v5  ;;  %v461_v6 = vmov %v1719_v6  ;;  %s474_s27 = smov [#allocation11]  ;;  %vm777_vm14 = vcmp.eq.s32.totalorder %v1719_v6, 0  ;;  %vm789_vm15 = vcmp.eq.s32.totalorder %v1719_v6, 7  ;;  %s1607_s23 = sphi %s1764_s23, %s453_s23  }
 0x113   : >>> { %v478_v5 = vmov %v1717_v5  ;;  %v481_v6 = vmov %v1719_v6  ;;  %v462_v50 = vld [vmem:[%s454_s24] sm:$0xff]  ;;  %vm465_vm5 = vcmp.eq.s32.totalorder %v461_v6, %v458_v5  ;;  %s494_s28 = smov [#allocation13]  ;;  %s455_s21 = smov [#allocation14] }
 0x114   : >>> { %vm485_vm6 = vcmp.eq.s32.totalorder %v481_v6, %v478_v5  ;;  %v498_v5 = vmov %v1717_v5  ;;  %v501_v6 = vmov %v1719_v6  ;;  %v466_v51 = vsel %vm465_vm5, %v462_v50, 0.0  ;;  %v482_v52 = vld [vmem:[%s474_s27] sm:$0xff]  ;;  %s475_s22 = smov [#allocation15]  ;;  %s495_s29 = smov [#allocation16] }
 0x115   : >>> { %vm505_vm7 = vcmp.eq.s32.totalorder %v501_v6, %v498_v5  ;;  %v467_v53 = vrot.slane %v466_v51, 4  ;;  %v486_v54 = vsel %vm485_vm6, %v482_v52, 0.0  ;;  %v502_v55 = vld [vmem:[%s494_s28] sm:$0xff]  ;;  %s518_s11 = smov [#allocation15]  ;;  %s516_s15 = smov [#allocation14]  ;;  %v567_v5 = vmov %v1717_v5 }
 0x116   : >>> { %v487_v56 = vrot.slane %v486_v54, 4  ;;  %v506_v57 = vsel %vm505_vm7, %v502_v55, 0.0  ;;  %s520_s24 = smov [#allocation16]  ;;  %s555_s27 = smov [#allocation17]  ;;  %v570_v6 = vmov %v1719_v6  ;;  %v582_v5 = vmov %v1717_v5 }
 0x117   : >>> { %v468_v58 = vadd.f32 %v467_v53, %v466_v51  ;;  %v507_v59 = vrot.slane %v506_v57, 4  ;;  %s557_s28 = smov [#allocation18]  ;;  %v585_v6 = vmov %v1719_v6  ;;  %vm572_vm12 = vcmp.eq.s32.totalorder %v570_v6, %v567_v5  ;;  %s1786_s14 = smov %s1721_s14 }
 0x118   : >>> { %v488_v60 = vadd.f32 %v487_v56, %v486_v54  ;;  %vm587_vm13 = vcmp.eq.s32.totalorder %v585_v6, %v582_v5  ;;  %s1789_s30 = smov %s1724_s30  ;;  %s1792_s17 = smov %s1727_s17  ;;  %v825_v52 = vld [vmem:[%s1786_s14] sm:$0xff]  ;;  %v680_v5 = vmov %v1717_v5  ;;  %v683_v6 = vmov %v1719_v6 }
 0x119   : >>> { %v469_v61 = vrot.slane %v468_v58, 2  ;;  %v508_v62 = vadd.f32 %v507_v59, %v506_v57  ;;  %s1796_s20 = smov %s1730_s20  ;;  %v826_v53 = vld [vmem:[%s1789_s30] sm:$0xff]  ;;  %s819_s26 = smov [#allocation22]  ;;  %v653_v5 = vmov %v1717_v5  ;;  %v656_v6 = vmov %v1719_v6 }
 0x11a   : >>> { %v489_v63 = vrot.slane %v488_v60, 2  ;;  %v827_v56 = vld [vmem:[%s1792_s17] sm:$0xff]  ;;  %v694_v5 = vmov %v1717_v5  ;;  %v697_v6 = vmov %v1719_v6  ;;  %vm687_vm0 = vcmp.eq.s32.totalorder %v683_v6, %v680_v5  ;;  %s453_s23 = sadd.s32 1, %s1607_s23  }
 0x11b   : >>> { %v470_v0 = vadd.f32 %v469_v61, %v468_v58  ;;  %v509_v1 = vrot.slane %v508_v62, 2  ;;  %v828_v57 = vld [vmem:[%s1796_s20] sm:$0xff]  ;;  %v667_v5 = vmov %v1717_v5  ;;  %v670_v6 = vmov %v1719_v6  ;;  %p450_p9 = scmp.ge.s32.totalorder %s453_s23, 15  }
 0x11c   : >>> { %v490_v2 = vadd.f32 %v489_v63, %v488_v60  ;;  %vm661_vm1 = vcmp.eq.s32.totalorder %v656_v6, %v653_v5  ;;  %vm702_vm3 = vcmp.eq.s32.totalorder %v697_v6, %v694_v5  ;;  %vm674_vm4 = vcmp.eq.s32.totalorder %v670_v6, %v667_v5 }
 0x11d   : >>> { %v471_v3 = vrot.slane %v470_v0, 1  ;;  %v510_v4 = vadd.f32 %v509_v1, %v508_v62  ;;  %vm716_vm5 = vcmp.eq.s32.totalorder %v1717_v5, 0  ;;  %vm720_vm6 = vcmp.eq.s32.totalorder %v1717_v5, 1 }
 0x11e   : >>> { %v491_v7 = vrot.slane %v490_v2, 1  ;;  %vm733_vm7 = vcmp.eq.s32.totalorder %v1717_v5, 7  ;;  %v354_v5 = vmov (%p450_p9), %v1717_v5  ;;  %v357_v6 = vmov (%p450_p9), %v1719_v6 }
 0x11f   : >>> { %v472_v8 = vadd.f32 %v471_v3, %v470_v0  ;;  %v511_v9 = vrot.slane %v510_v4, 1  ;;  %v407_v5 = vmov (%p450_p9), %v1717_v5 }
 0x120   : >>> { %v492_v10 = vadd.f32 %v491_v7, %v490_v2 }
 0x121   : >>> { %473 = vst [vmem:[%s455_s21] sm:$0x1] %v472_v8  ;;  %v512_v11 = vadd.f32 %v511_v9, %v510_v4  ;;  %s514_s21 = smov [#allocation19] }
 0x122   : >>> { %493 = vst [vmem:[%s475_s22] sm:$0x1] %v492_v10  ;;  %s515_s22 = smov [#allocation20]  ;;  %s559_s21 = smov %s514_s21 }
 0x123   : >>> { %513 = vst [vmem:[%s495_s29] sm:$0x1] %v512_v11  ;;  %s561_s22 = smov %s515_s22  ;;  %s563_s29 = smov [#allocation19] }
 0x128   : >>> { %v517_v14 = vld [vmem:[%s516_s15] sm:$0xff]  ;;  %s576_s15 = smov [#allocation21] }
 0x129   : >>> { %v519_v12 = vld [vmem:[%s518_s11] sm:$0xff]  ;;  %v540_v27 = vand.u32 2147483647, %v517_v14  ;;  %s578_s11 = smov [#allocation20] }
 0x12a   : >>> { %v523_v13 = vmul.f32 2.0, %v519_v12  ;;  %v521_v15 = vld [vmem:[%s520_s24] sm:$0xff]  ;;  %v541_v32 = vand.u32 2147483647, %v519_v12  ;;  %s593_s24 = smov [#allocation21] }
 0x12b   : >>> { %v522_v16 = vsub.f32 %v521_v15, %v517_v14  ;;  %v542_v28 = vand.u32 2147483647, %v521_v15 }
 0x12c   : >>> { %1561 = vrcp.f32 %v523_v13 }
 0x12d   : >>> { %v543_v31 = vmin.f32 %v540_v27, %v542_v28 }
 0x12f   : >>> { %v544_v33 = vmul.f32 1.1920929e-08, %v543_v31 }
 0x131   : >>> { %vm545_vm11 = vcmp.le.f32.partialorder %v541_v32, %v544_v33 }
 0x136   : >>> { %v1562_v17 = vpop.eup %1561 }
 0x137   : >>> { %v525_v18 = vmul.f32 %v1562_v17, %v522_v16 }
 0x139   : >>> { %v527_v19 = vmul.f32 %v525_v18, %v525_v18  ;;  %vm526_vm10 = vcmp.ge.f32.partialorder %v525_v18, 0.0 }
 0x13b   : >>> { %v528_v20 = vadd.f32 1.0, %v527_v19 }
 0x13d   : >>> { %1563 = vrsqrt.f32 %v528_v20  ;;  %vm531_vm8 = vcmp.eq.f32.partialorder %v528_v20, inf  ;;  %v534_v22 = vand.u32 2147483648, %v528_v20  ;;  %vm533_vm9 = vcmp.eq.f32.partialorder %v528_v20, 0.0 }
 0x147   : >>> { %v1564_v21 = vpop.eup %1563 }
 0x148   : >>> { %v530_v23 = vmul.f32 %v1564_v21, %v528_v20 }
 0x14a   : >>> { %v532_v24 = vsel %vm531_vm8, %v528_v20, %v530_v23  ;;  %vm369_vm8 = vcmp.eq.s32.totalorder (%p450_p9), %v357_v6, %v354_v5  ;;  %v410_v6 = vmov (%p450_p9), %v1719_v6  ;;  %v373_v5 = vmov (%p450_p9), %v1717_v5 }
 0x14b   : >>> { %v535_v25 = vsel %vm533_vm9, %v534_v22, %v532_v24  ;;  %v376_v6 = vmov (%p450_p9), %v1719_v6  ;;  %v390_v5 = vmov (%p450_p9), %v1717_v5  ;;  %vm422_vm9 = vcmp.eq.s32.totalorder (%p450_p9), %v410_v6, %v407_v5 }
 0x14c   : >>> { %v536_v26 = vxor.u32 2147483648, %v535_v25  ;;  %v393_v6 = vmov (%p450_p9), %v1719_v6 }
 0x14e   : >>> { %v537_v29 = vsel %vm526_vm10, %v535_v25, %v536_v26 }
 0x14f   : >>> { %v538_v30 = vadd.f32 %v537_v29, %v525_v18 }
 0x151   : >>> { %1565 = vrcp.f32 %v538_v30 }
 0x15b   : >>> { %v1566_v34 = vpop.eup %1565 }
 0x15c   : >>> { %v546_v35 = vsel %vm545_vm11, 0.0, %v1566_v34 }
 0x15d   : >>> { %v547_v36 = vmul.f32 %v546_v35, %v546_v35  ;;  %v551_v37 = vmul.f32 %v546_v35, %v519_v12 }
 0x15f   : >>> { %v548_v38 = vadd.f32 1.0, %v547_v36  ;;  %v552_v39 = vsub.f32 %v517_v14, %v551_v37  ;;  %v554_v40 = vadd.f32 %v551_v37, %v521_v15 }
 0x161   : >>> { %1567 = vrsqrt.f32 %v548_v38  ;;  %556 = vst [vmem:[%s555_s27] sm:$0xff] %v552_v39  ;;  %558 = vst [vmem:[%s557_s28] sm:$0xff] %v554_v40  ;;  %s1779_s27 = smov [#allocation10]  ;;  %s591_s28 = smov [#allocation22] }
 0x162   : >>> { %v601_v49 = vld [vmem:[%s1779_s27] sm:$0xff] }
 0x16b   : >>> { %v1568_v41 = vpop.eup %1567 }
 0x16c   : >>> { %560 = vst [vmem:[%s559_s21] sm:$0xff] %v1568_v41  ;;  %v550_v42 = vmul.f32 %v1568_v41, %v546_v35  ;;  %s1781_s21 = smov [#allocation11] }
 0x16d   : >>> { %v602_v50 = vld [vmem:[%s1781_s21] sm:$0xff] }
 0x16e   : >>> { %562 = vst [vmem:[%s561_s22] sm:$0xff] %v550_v42  ;;  %s1783_s22 = smov [#allocation13] }
 0x16f   : >>> { %v604_v51 = vld [vmem:[%s1783_s22] sm:$0xff] }
 0x173   : >>> { %v564_v43 = vld [vmem:[%s563_s29] ss:$0 sm:$0xff]  ;;  %s817_s29 = smov [#allocation21] }
 0x174   : >>> { %v573_v44 = vsel %vm572_vm12, %v564_v43, 0.0 }
 0x175   : >>> { %574 = vadd.xlane.f32.xlu0 %v573_v44  ;;  %v579_v45 = vld [vmem:[%s578_s11] ss:$0 sm:$0xff]  ;;  %s1798_s11 = smov [#allocation12] }
 0x176   : >>> { %v588_v46 = vsel %vm587_vm13, %v579_v45, 0.0  ;;  %v603_v58 = vld [vmem:[%s1798_s11] sm:$0xff] }
 0x179   : >>> { %589 = vadd.xlane.f32.xlu0 %v588_v46 }
 0x202   : >>> { %v575_v47 = vpop.xlane.xlu0 %574 }
 0x203   : >>> { %577 = vst [vmem:[%s576_s15] sm:$0xff] %v575_v47  ;;  %s595_s15 = smov [#allocation22] }
 0x206   : >>> { %v590_v48 = vpop.xlane.xlu0 %589 }
 0x207   : >>> { %592 = vst [vmem:[%s591_s28] sm:$0xff] %v590_v48  ;;  %s1825_s28 = smov [#allocation12] }
 0x20a   : >>> { %v594_v54 = vld [vmem:[%s593_s24] sm:$0xff]  ;;  %s623_s24 = smov [#allocation20] }
 0x20b   : >>> { %v818_v55 = vld [vmem:[%s817_s29] sm:$0xff]  ;;  %v605_v59 = vmul.f32 %v601_v49, %v594_v54  ;;  %v608_v60 = vmul.f32 %v602_v50, %v594_v54  ;;  %v615_v61 = vmul.f32 %v604_v51, %v594_v54  ;;  %v612_v4 = vmul.f32 %v603_v58, %v594_v54  ;;  %s650_s29 = smov [#allocation17] }
 0x20c   : >>> { %v829_v62 = vmul.f32 %v825_v52, %v818_v55  ;;  %v832_v63 = vmul.f32 %v826_v53, %v818_v55  ;;  %v836_v0 = vmul.f32 %v827_v56, %v818_v55  ;;  %v839_v1 = vmul.f32 %v828_v57, %v818_v55  ;;  %v624_v24 = vld [vmem:[%s623_s24] ss:$0 sm:$0xff]  ;;  %s690_s24 = smov [#allocation13] }
 0x20d   : >>> { %v657_v55 = vld [vmem:[%s650_s29] ss:$0 sm:$0xff]  ;;  %s706_s29 = smov [#allocation11] }
 0x20e   : >>> { %v596_v2 = vld [vmem:[%s595_s15] sm:$0xff]  ;;  %s677_s15 = smov [#allocation12] }
 0x20f   : >>> { %v820_v3 = vld [vmem:[%s819_s26] sm:$0xff]  ;;  %v609_v7 = vmul.f32 %v604_v51, %v596_v2  ;;  %v611_v8 = vmul.f32 %v601_v49, %v596_v2  ;;  %v614_v9 = vmul.f32 %v602_v50, %v596_v2  ;;  %v606_v14 = vmul.f32 %v603_v58, %v596_v2  ;;  %s621_s26 = smov [#allocation19] }
 0x210   : >>> { %v830_v10 = vmul.f32 %v827_v56, %v820_v3  ;;  %v833_v11 = vmul.f32 %v828_v57, %v820_v3  ;;  %v835_v12 = vmul.f32 %v825_v52, %v820_v3  ;;  %v838_v13 = vmul.f32 %v826_v53, %v820_v3  ;;  %v622_v23 = vld [vmem:[%s621_s26] ss:$0 sm:$0xff]  ;;  %s649_s26 = smov [#allocation10] }
 0x211   : >>> { %v610_v15 = vsub.f32 %v608_v60, %v609_v7  ;;  %v616_v16 = vadd.f32 %v615_v61, %v614_v9  ;;  %v613_v18 = vadd.f32 %v612_v4, %v611_v8  ;;  %v607_v22 = vsub.f32 %v605_v59, %v606_v14 }
 0x212   : >>> { %v831_v17 = vsub.f32 %v829_v62, %v830_v10  ;;  %v834_v19 = vsub.f32 %v832_v63, %v833_v11  ;;  %v837_v20 = vadd.f32 %v836_v0, %v835_v12  ;;  %v840_v21 = vadd.f32 %v839_v1, %v838_v13 }
 0x213   : >>> { %618 = vst [vmem:[%s1781_s21] sm:$0xff] %v610_v15  ;;  %620 = vst [vmem:[%s1783_s22] sm:$0xff] %v616_v16  ;;  %s1827_s21 = smov [#allocation13]  ;;  %s1831_s22 = smov [#allocation11] }
 0x214   : >>> { %841 = vst [vmem:[%s1786_s14] sm:$0xff] %v831_v17  ;;  %619 = vst [vmem:[%s1798_s11] sm:$0xff] %v613_v18  ;;  %s845_s14 = smov %s1721_s14  ;;  %s691_s11 = smov [#allocation18] }
 0x215   : >>> { %842 = vst [vmem:[%s1789_s30] sm:$0xff] %v834_v19  ;;  %843 = vst [vmem:[%s1792_s17] sm:$0xff] %v837_v20  ;;  %s846_s17 = smov %s1727_s17  ;;  %s1818_s30 = smov %s1724_s30  ;;  %v698_v56 = vld [vmem:[%s691_s11] ss:$0 sm:$0xff] }
 0x216   : >>> { %844 = vst [vmem:[%s1796_s20] sm:$0xff] %v840_v21  ;;  %617 = vst [vmem:[%s1779_s27] sm:$0xff] %v607_v22  ;;  %s1821_s20 = smov %s1730_s20  ;;  %s1829_s27 = smov [#allocation10] }
 0x217   : >>> { %s1611_s11 = smov 127  }
 0x21a   : >>> { %v632_v39 = vld [vmem:[%s1827_s21] sm:$0xff] }
 0x21b   : >>> { %v847_v25 = vld [vmem:[%s845_s14] ss:$0 sm:$0xff]  ;;  %v1489_v27 = vld [vmem:[%s845_s14 + $0x7] ss:$0 sm:$0xff]  ;;  %v640_v42 = vmul.f32 %v632_v39, %v624_v24  ;;  %v643_v46 = vmul.f32 %v632_v39, %v622_v23 }
 0x21c   : >>> { %v1488_v26 = vld [vmem:[%s845_s14 - $0x1] sm:$0xfe]  ;;  %v1493_v34 = vld [vmem:[%s1818_s30 + $0x7] ss:$0 sm:$0xff] }
 0x21d   : >>> { %v854_v28 = vsel %vm777_vm14, %v847_v25, %v1488_v26  ;;  %v858_v29 = vld [vmem:[%s846_s17] ss:$0 sm:$0xff]  ;;  %v1491_v30 = vld [vmem:[%s846_s17 + $0x1] sm:$0x7f] }
 0x21e   : >>> { %v871_v31 = vld [vmem:[%s1818_s30] ss:$0 sm:$0xff]  ;;  %857 = vst [vmem:[%s845_s14] sm:$0xff] %v854_v28  ;;  %v866_v32 = vsel %vm789_vm15, %v1489_v27, %v1491_v30  ;;  %v1495_v37 = vld [vmem:[%s1821_s20 + $0x1] sm:$0x7f] }
 0x21f   : >>> { %v1492_v33 = vld [vmem:[%s1818_s30 - $0x1] sm:$0xfe]  ;;  %1490 = vst [vmem:[%s845_s14 + $0x1] sm:$0x1] %v858_v29  ;;  %868 = vst [vmem:[%s846_s17] sm:$0xff] %v866_v32  ;;  %v890_v40 = vsel %vm789_vm15, %v1493_v34, %v1495_v37 }
 0x220   : >>> { %v882_v35 = vld [vmem:[%s1821_s20] ss:$0 sm:$0xff]  ;;  %v878_v36 = vsel %vm777_vm14, %v871_v31, %v1492_v33 }
 0x221   : >>> { %v631_v38 = vld [vmem:[%s1825_s28] sm:$0xff]  ;;  %881 = vst [vmem:[%s1818_s30] sm:$0xff] %v878_v36  ;;  %892 = vst [vmem:[%s1821_s20] sm:$0xff] %v890_v40 }
 0x222   : >>> { %v639_v41 = vmul.f32 %v631_v38, %v622_v23  ;;  %v642_v43 = vmul.f32 %v631_v38, %v624_v24  ;;  %v629_v44 = vld [vmem:[%s1829_s27] sm:$0xff]  ;;  %1494 = vst [vmem:[%s1818_s30 + $0x1] sm:$0x1] %v882_v35 }
 0x223   : >>> { %v630_v45 = vld [vmem:[%s1831_s22] sm:$0xff]  ;;  %v633_v47 = vmul.f32 %v629_v44, %v622_v23  ;;  %v636_v49 = vmul.f32 %v629_v44, %v624_v24 }
 0x224   : >>> { %v634_v48 = vmul.f32 %v630_v45, %v624_v24  ;;  %v641_v50 = vsub.f32 %v639_v41, %v640_v42  ;;  %v637_v51 = vmul.f32 %v630_v45, %v622_v23  ;;  %v644_v52 = vadd.f32 %v643_v46, %v642_v43 }
 0x226   : >>> { %v635_v53 = vsub.f32 %v633_v47, %v634_v48  ;;  %647 = vst [vmem:[%s1825_s28] sm:$0xff] %v641_v50  ;;  %v638_v54 = vadd.f32 %v637_v51, %v636_v49  ;;  %648 = vst [vmem:[%s1827_s21] sm:$0xff] %v644_v52  ;;  %s664_s28 = smov [#allocation11]  ;;  %s1865_s21 = smov [#allocation12] }
 0x228   : >>> { %645 = vst [vmem:[%s1829_s27] sm:$0xff] %v635_v53  ;;  %646 = vst [vmem:[%s1831_s22] sm:$0xff] %v638_v54  ;;  %s705_s27 = smov [#allocation10]  ;;  %s1610_s22 = smov 1  }
 0x22d   : >>> { %v684_v57 = vld [vmem:[%s677_s15] sm:$0xff] }
 0x22e   : >>> { %v688_v58 = vsel %vm687_vm0, 0.0, %v684_v57  ;;  %v699_v60 = vld [vmem:[%s690_s24] sm:$0xff] }
 0x22f   : >>> { %v658_v59 = vld [vmem:[%s649_s26] sm:$0xff]  ;;  %689 = vst [vmem:[%s677_s15] sm:$0xff] %v688_v58  ;;  %v703_v63 = vsel %vm702_vm3, %v698_v56, %v699_v60  ;;  %s1868_s15 = smov [#allocation13] }
 0x230   : >>> { %v662_v61 = vsel %vm661_vm1, %v657_v55, %v658_v59  ;;  %v671_v62 = vld [vmem:[%s664_s28] sm:$0xff]  ;;  %704 = vst [vmem:[%s690_s24] sm:$0xff] %v703_v63  ;;  %s793_s24 = smov [#allocation11] }
 0x231   : >>> { %663 = vst [vmem:[%s649_s26] sm:$0xff] %v662_v61  ;;  %v675_v0 = vsel %vm674_vm4, 0.0, %v671_v62  ;;  %s769_s26 = smov [#allocation10] }
 0x232   : >>> { %676 = vst [vmem:[%s664_s28] sm:$0xff] %v675_v0  ;;  %s770_s28 = smov [#allocation12] }
 0x236   : >>> { %v743_v1 = vld [vmem:[%s1865_s21] sm:$0xff] }
 0x237   : >>> { %744 = vrot.lane.b32.xlu0 %v743_v1, %s1610_s22  ;;  %v739_v4 = vld [vmem:[%s1868_s15] sm:$0xff] }
 0x238   : >>> { %v711_v2 = vld [vmem:[%s705_s27] sm:$0xff] }
 0x239   : >>> { %712 = vrot.lane.b32.xlu1 %v711_v2, %s1610_s22  ;;  %v707_v3 = vld [vmem:[%s706_s29] sm:$0xff] }
 0x23d   : >>> { %708 = vrot.lane.b32.xlu1 %v707_v3, %s1610_s22 }
 0x241   : >>> { %729 = vrot.lane.b32.xlu1 %v707_v3, %s1611_s11 }
 0x245   : >>> { %740 = vrot.lane.b32.xlu1 %v739_v4, %s1610_s22  ;;  %s358_s22 = smov (%p450_p9), [#allocation10] }
 0x249   : >>> { %761 = vrot.lane.b32.xlu1 %v739_v4, %s1611_s11  ;;  %s394_s11 = smov (%p450_p9), [#allocation12] }
 0x2a9   : >>> { %v745_v13 = vpop.permute.xlu0 %744 }
 0x2aa   : >>> { %v749_v15 = vsel %vm716_vm5, %v743_v1, %v745_v13 }
 0x2ab   : >>> { %v713_v7 = vpop.permute.xlu1 %712 }
 0x2ac   : >>> { %v717_v8 = vsel %vm716_vm5, %v711_v2, %v713_v7 }
 0x2af   : >>> { %v709_v9 = vpop.permute.xlu1 %708 }
 0x2b0   : >>> { %v721_v10 = vsel %vm720_vm6, %v709_v9, %v717_v8 }
 0x2b1   : >>> { %v727_v11 = vsel %vm1349_vm2, %v721_v10, 0.0 }
 0x2b2   : >>> { %735 = vst [vmem:[%s705_s27] sm:$0xff] %v727_v11  ;;  %s794_s27 = smov [#allocation13] }
 0x2b3   : >>> { %v730_v12 = vpop.permute.xlu1 %729 }
 0x2b4   : >>> { %v734_v14 = vsel %vm733_vm7, %v711_v2, %v730_v12 }
 0x2b5   : >>> { %736 = vst [vmem:[%s706_s29] sm:$0xff] %v734_v14  ;;  %s377_s29 = smov (%p450_p9), [#allocation11] }
 0x2b7   : >>> { %v741_v16 = vpop.permute.xlu1 %740 }
 0x2b8   : >>> { %v753_v17 = vsel %vm720_vm6, %v741_v16, %v749_v15 }
 0x2b9   : >>> { %v771_v18 = vld [vmem:[%s769_s26] ss:$0 sm:$0xff]  ;;  %v1481_v20 = vld [vmem:[%s769_s26 + $0x7] ss:$0 sm:$0xff]  ;;  %v759_v22 = vsel %vm1349_vm2, %v753_v17, 0.0 }
 0x2ba   : >>> { %v1480_v19 = vld [vmem:[%s769_s26 - $0x1] sm:$0xfe]  ;;  %767 = vst [vmem:[%s1865_s21] sm:$0xff] %v759_v22  ;;  %s893_s21 = sadd.s32 (%p450_p9), 1, %s1603_s16  }
 0x2bb   : >>> { %v778_v21 = vsel %vm777_vm14, %v771_v18, %v1480_v19  ;;  %v762_v23 = vpop.permute.xlu1 %761  ;;  %p446_p10 = scmp.ge.s32.totalorder (%p450_p9), %s893_s21, 15  ;;  %s1983_s16 = smov (%p450_p9), %s893_s21 }
 0x2bc   : >>> { %781 = vst [vmem:[%s769_s26] sm:$0xff] %v778_v21  ;;  %v795_v24 = vld [vmem:[%s793_s24] ss:$0 sm:$0xff]  ;;  %v1485_v26 = vld [vmem:[%s793_s24 + $0x7] ss:$0 sm:$0xff]  ;;  %v766_v27 = vsel %vm733_vm7, %v743_v1, %v762_v23 }
 0x2bd   : >>> { %v1484_v25 = vld [vmem:[%s793_s24 - $0x1] sm:$0xfe]  ;;  %768 = vst [vmem:[%s1868_s15] sm:$0xff] %v766_v27  ;;  %s411_s15 = smov (%p450_p9), [#allocation13] }
 0x2be   : >>> { %v802_v28 = vsel %vm777_vm14, %v795_v24, %v1484_v25 }
 0x2bf   : >>> { %805 = vst [vmem:[%s793_s24] sm:$0xff] %v802_v28 }
 0x2c1   : >>> { %v782_v29 = vld [vmem:[%s770_s28] ss:$0 sm:$0xff]  ;;  %v1483_v30 = vld [vmem:[%s770_s28 + $0x1] sm:$0x7f] }
 0x2c2   : >>> { %1482 = vst [vmem:[%s769_s26 + $0x1] sm:$0x1] %v782_v29  ;;  %v790_v31 = vsel %vm789_vm15, %v1481_v20, %v1483_v30  ;;  %452 = sbr.rel (!%p450_p9) target bundleno = 274 (0x112), region = 502 }
 0x2c3   : >>> { %792 = vst [vmem:[%s770_s28] sm:$0xff] %v790_v31 }
 0x2c4   : >>> { %v806_v32 = vld [vmem:[%s794_s27] ss:$0 sm:$0xff]  ;;  %v1487_v33 = vld [vmem:[%s794_s27 + $0x1] sm:$0x7f] }
 0x2c5   : >>> { %1486 = vst [vmem:[%s793_s24 + $0x1] sm:$0x1] %v806_v32  ;;  %v814_v34 = vsel %vm789_vm15, %v1485_v26, %v1487_v33 }
 0x2c6   : >>> { %816 = vst [vmem:[%s794_s27] sm:$0xff] %v814_v34 }
 0x2c9   : >> { %v364_v35 = vld [vmem:[%s358_s22] sm:$0xff] }
 0x2ca   : >> { %v365_v37 = vsel %vm1349_vm2, %v364_v35, 0.0  ;;  %v400_v39 = vld [vmem:[%s394_s11] sm:$0xff] }
 0x2cb   : >> { %v366_v41 = vmul.f32 %v365_v37, %v365_v37  ;;  %v401_v43 = vsel %vm1349_vm2, %v400_v39, 0.0 }
 0x2cc   : >> { %v383_v36 = vld [vmem:[%s377_s29] sm:$0xff]  ;;  %v402_v45 = vmul.f32 %v401_v43, %v401_v43 }
 0x2cd   : >> { %v384_v38 = vsel %vm1349_vm2, %v383_v36, 0.0  ;;  %v417_v40 = vld [vmem:[%s411_s15] sm:$0xff]  ;;  %v370_v48 = vsel %vm369_vm8, 0.0, %v366_v41 }
 0x2ce   : >> { %v385_v42 = vmul.f32 %v384_v38, %v384_v38  ;;  %v418_v44 = vsel %vm1349_vm2, %v417_v40, 0.0 }
 0x2cf   : >> { %v419_v47 = vmul.f32 %v418_v44, %v418_v44 }
 0x2d0   : >> { %v387_v46 = vadd.f32 %v385_v42, %v366_v41  ;;  %v386_v49 = vadd.f32 %v385_v42, %v370_v48 }
 0x2d1   : >> { %v423_v52 = vsel %vm422_vm9, 0.0, %v419_v47 }
 0x2d2   : >> { %v404_v50 = vadd.f32 %v402_v45, %v387_v46  ;;  %v403_v51 = vadd.f32 %v402_v45, %v386_v49 }
 0x2d4   : >> { %v425_v53 = vadd.f32 %v419_v47, %v404_v50  ;;  %v424_v54 = vadd.f32 %v423_v52, %v403_v51 }
 0x2d6   : >> { %426 = vadd.xlane.f32.xlu0 %v425_v53 }
 0x2da   : >> { %434 = vadd.xlane.f32.xlu0 %v424_v54 }
 0x363   : >> { %v427_v55 = vpop.xlane.xlu0 %426 }
 0x364   : >> { %v428_v56 = vrot.slane %v427_v55, 4 }
 0x366   : >> { %v429_v57 = vadd.f32 %v428_v56, %v427_v55 }
 0x367   : >> { %v435_v58 = vpop.xlane.xlu0 %434 }
 0x368   : >> { %v430_v59 = vrot.slane %v429_v57, 2  ;;  %v436_v60 = vrot.slane %v435_v58, 4 }
 0x36a   : >> { %v437_v61 = vadd.f32 %v436_v60, %v435_v58  ;;  %v431_v62 = vadd.f32 %v430_v59, %v429_v57 }
 0x36c   : >> { %v438_v63 = vrot.slane %v437_v61, 2  ;;  %v432_v1 = vrot.slane %v431_v62, 1 }
 0x36e   : >> { %v439_v0 = vadd.f32 %v438_v63, %v437_v61  ;;  %v433_v4 = vadd.f32 %v432_v1, %v431_v62 }
 0x370   : >> { %v440_v2 = vrot.slane %v439_v0, 1 }
 0x372   : >> { %v441_v3 = vadd.f32 %v440_v2, %v439_v0 }
 0x374   : >> { %1514 = vpush %v441_v3 }
 0x375   : >> { %1516 = vpush %v433_v4 }
 0x3a5   : >> { %s1515_s23 = spop %1514 }
 0x3a6   : >> { %s1517_s26 = spop %1516 }
 0x3a7   : >> { %s444_s24 = smul.f32 1e-10, %s1517_s26 }
 0x3a9   : >> { %p445_p11 = scmp.le.f32.partialorder %s1515_s23, %s444_s24 }
 0x3ab   : >> { %p447_p12 = por %p446_p10, %p445_p11 }
 0x3ad   : > { %895 = sbr.rel (!%p447_p12) target bundleno = 273 (0x111), region = 513 }
 0x3b4 PF: > { %s900_s28 = smov [#allocation10]  ;;  %v904_v5 = vmov %v1717_v5  ;;  %v907_v6 = vmov %v1719_v6  ;;  %s920_s16 = smov [#allocation13] }
 0x3b5   : > { %v924_v5 = vmov %v1717_v5  ;;  %v927_v6 = vmov %v1719_v6  ;;  %v908_v7 = vld [vmem:[%s900_s28] sm:$0xff]  ;;  %vm911_vm10 = vcmp.eq.s32.totalorder %v907_v6, %v904_v5  ;;  %s896_s27 = sand.u32 7, %s1678_s12   ;;  %s1984_s22 = scalar_lea.vmem [#allocation5], %s1715_s18 }
 0x3b6   : > { %vm931_vm11 = vcmp.eq.s32.totalorder %v927_v6, %v924_v5  ;;  %v912_v8 = vsel %vm911_vm10, %v908_v7, 0.0  ;;  %v928_v10 = vld [vmem:[%s920_s16] sm:$0xff]  ;;  %s897_s21 = scalar_lea.vmem %s283_s25, %s896_s27 [#allocation4]  ;;  %s899_s29 = scalar_lea.vmem %s1984_s22, %s896_s27 [#allocation5] }
 0x3b7   : > { %v913_v9 = vrot.slane %v912_v8, 4  ;;  %v932_v11 = vsel %vm931_vm11, %v928_v10, 0.0  ;;  %s901_s21 = smov %s897_s21  ;;  %s921_s29 = smov %s899_s29 }
 0x3b8   : > { %v933_v13 = vrot.slane %v932_v11, 4  ;;  %s967_s11 = sshrl.u32 (%p1692_p3), %s1678_s12, 3 }
 0x3b9   : > { %v914_v12 = vadd.f32 %v913_v9, %v912_v8  ;;  %s1502_s15 = sshll.u32 (%p1692_p3), %s967_s11, 3 }
 0x3ba   : > { %v934_v15 = vadd.f32 %v933_v13, %v932_v11  ;;  %s969_s24 = scalar_lea.vmem (%p1692_p3), %s1975_s4, %s1502_s15 }
 0x3bb   : > { %v915_v14 = vrot.slane %v914_v12, 2 }
 0x3bc   : > { %v935_v17 = vrot.slane %v934_v15, 2 }
 0x3bd   : > { %v916_v16 = vadd.f32 %v915_v14, %v914_v12 }
 0x3be   : > { %v936_v19 = vadd.f32 %v935_v17, %v934_v15  ;;  %966 = sbr.rel (!%p1692_p3) target bundleno = 972 (0x3cc), region = 174 }
 0x3bf   : > { %v917_v18 = vrot.slane %v916_v16, 1 }
 0x3c0   : > { %v937_v6 = vrot.slane %v936_v19, 1 }
 0x3c1   : > { %v918_v5 = vadd.f32 %v917_v18, %v916_v16 }
 0x3c2   : > { %v938_v20 = vadd.f32 %v937_v6, %v936_v19 }
 0x3c3   : > { %919 = vst [vmem:[%s901_s21] sm:$0x1] %v918_v5 }
 0x3c4   : > { %939 = vst [vmem:[%s921_s29] sm:$0x1] %v938_v20 }
 0x3ca   : > { %v997_v21 = vld [vmem:[%s283_s25] sm:$0xff] }
 0x3cb   : > { %998 = vst [vmem:[%s969_s24] sm:$0xff] %v997_v21 }
 0x3cc PF: > { %1004 = sbr.rel (!%p1692_p3) target bundleno = 980 (0x3d4), region = 212  ;;  %s1005_s28 = sshrl.u32 (%p1692_p3), %s1678_s12, 3 }
 0x3cd   : > { %s1985_s16 = scalar_lea.vmem (%p1692_p3), [#allocation5], %s1715_s18  ;;  %s1503_s27 = sshll.u32 (%p1692_p3), %s1005_s28, 3 }
 0x3ce   : > { %s1007_s25 = scalar_lea.vmem (%p1692_p3), %s1976_s5, %s1503_s27 }
 0x3d2   : > { %v1035_v22 = vld [vmem:[%s1985_s16] sm:$0xff] (%p1692_p3) }
 0x3d3   : > { %1036 = vst [vmem:[%s1007_s25] sm:$0xff] %v1035_v22 }
 0x3d4 PF: > { %s1504_s29 = sshll.u32 %s1678_s12, 3  ;;  %v1069_v23 = vld [vmem:[%s1721_s14] sm:$0xff]  ;;  %v1103_v24 = vld [vmem:[%s1724_s30] sm:$0xff] }
 0x3d5   : > { %v1137_v25 = vld [vmem:[%s1727_s17] sm:$0xff]  ;;  %s1041_s18 = scalar_lea.vmem %s1977_s6, %s1504_s29  ;;  %s1075_s26 = scalar_lea.vmem %s1978_s7, %s1504_s29  ;;  %v1171_v26 = vld [vmem:[%s1730_s20] sm:$0xff] }
 0x3d6   : > { %1070 = vst [vmem:[%s1041_s18] sm:$0xff] %v1069_v23  ;;  %1104 = vst [vmem:[%s1075_s26] sm:$0xff] %v1103_v24  ;;  %s1109_s16 = scalar_lea.vmem %s1979_s8, %s1504_s29  ;;  %s1143_s14 = scalar_lea.vmem %s1980_s9, %s1504_s29 }
 0x3d7   : > { %1138 = vst [vmem:[%s1109_s16] sm:$0xff] %v1137_v25  ;;  %1172 = vst [vmem:[%s1143_s14] sm:$0xff] %v1171_v26 }
 0x3d8 PF: > { %s1986_s17 = sld [smem:[#allocation23_spill]]  ;;  %p13_p13 = scmp.ge.s32.totalorder %s1681_s13, 10  }
 0x3d9   : > { %s1987_s30 = smov %s1595_s10  ;;  %s1989_s11 = smov %s1681_s13 }
 0x3da   :  { %15 = sbr.rel (!%p13_p13) target bundleno = 2 (0x2), region = 524 }
 0x3de   : > { %s1988_s10 = smov %s1986_s17 }

// kernel: spd_exp_map.1
= control target key start
LH: loop header
LB: loop body
LE: loop exit
PB: predicated region body
PF: predicated region fallthrough
CT: control target
= control target key end

     0   :  { %7 = vsyncpa [#allocation3], 0  ;;  %s1038_s0 = inlined_call_operand.vmem [shape: f32[2,4,16,16], index: 0, kind: input, shape index: {}]   ;;  %s1039_s1 = inlined_call_operand.vmem [shape: f32[2,4,16], index: 1, kind: input, shape index: {}]   ;;  %s1040_s2 = inlined_call_operand.hbm [shape: f32[2,4,16,16], index: 2, kind: output, shape index: {}]  }
   0x1   :  { %9 = vsyncpa [#allocation3 + $0x1], 0  ;;  %s894_s9 = smov 0   ;;  %s896_s10 = smov 0  }
   0x2   :  { %s898_s11 = smov 0   ;;  %s900_s12 = smov 0  }
   0x3 LB: > { %s915_s13 = sadd.s32 4294967295, %s873_s12   ;;  %s668_s14 = sadd.s32 4294967294, %s873_s12   ;;  %s873_s12 = sphi %s900_s12, %s1048_s12   ;;  %s869_s11 = sphi %s898_s11, %s1047_s11   ;;  %s865_s10 = sphi %s896_s10, %s1046_s10   ;;  %s861_s9 = sphi %s894_s9, %s1045_s9  }
   0x4   : > { %s919_s15 = sadd.s32 1, %s873_s12   ;;  %s74_s16 = sadd.s32 1, %s869_s11 }
   0x5   : > { %s71_s17 = ssub.s32 %s873_s12, %s919_s15  ;;  %p84_p0 = scmp.ne.s32.totalorder %s869_s11, %s865_s10 }
   0x6   : > { %p72_p1 = scmp.eq.s32.totalorder %s71_s17, 0  ;;  %p85_p2 = scmp.eq.s32.totalorder %s915_s13, 1 }
   0x7   : > { %p90_p3 = scmp.ne.s32.totalorder %s865_s10, %s861_s9  ;;  %p91_p4 = scmp.eq.s32.totalorder %s668_s14, 1 }
   0x8   : > { %s930_s18 = scalar_select %p72_p1, %s869_s11, %s74_s16  }
   0x9   : > { %p932_p5 = por %p85_p2, %p84_p0  ;;  %p936_p6 = por %p91_p4, %p90_p3 }
   0xa   : > { %p671_p7 = scmp.ge.s32.totalorder %s873_s12, 1  ;;  %p124_p8 = scmp.lt.s32.totalorder %s873_s12, 3 }
   0xc   : > { %p125_p9 = pnand %p671_p7, %p124_p8 }
   0xd   : > { %p150_p10 = scmp.lt.s32.totalorder (!%p125_p9), %s915_s13, 1  ;;  %vm223_vm0 = vcmask (!%p125_p9), 130048   ;;  %v875_v9 = vmov (!%p125_p9), 1966171168   ;;  %v174_v11 = vlaneseq (!%p125_p9)  ;;  %s147_s30 = sand.u32 (!%p125_p9), 1, %s865_s10  }
   0xe   : > { %128 = sbr.rel (%p125_p9) target bundleno = 287 (0x11f), region = 28  ;;  %vm952_vm1 = vmpackc.low (!%p125_p9), %vm223_vm0, %vm223_vm0  ;;  %v172_v10 = vunpack.c.l.s4 (!%p125_p9), %v875_v9  ;;  %s672_s3 = sshll.u32 (!%p125_p9), %s147_s30, 6 }
   0xf   : > { %v175_v19 = vshrl.u32 (!%p125_p9), %v174_v11, 7  ;;  %s149_s4 = scalar_lea.vmem (!%p125_p9), [#allocation2], %s672_s3  ;;  %s698_s5 = sshll.u32 (!%p125_p9), %s915_s13, 10 }
  0x10   : > { %v173_v18 = vunpack.c.0.s8 (!%p125_p9), %v172_v10  ;;  %s594_s6 = sshll.u32 (!%p125_p9), %s149_s4, 4  ;;  %s990_s14 = scalar_lea.hbm (!%p125_p9), %s1040_s2, %s698_s5  ;;  %s992_s6 = int_to_ptr.vmem [resolvable:$true] %s594_s6 }
  0x11   : > { %v197_v23 = vsub.s32 (!%p125_p9), 0, %v175_v19  ;;  %s811_s16 = scalar_lea.vmem (!%p125_p9), %s992_s6, 1024  ;;  %s876_s17 = smov (!%p125_p9), [#allocation2]  }
  0x12   : > { %v176_v20 = vsub.s32 (!%p125_p9), %v173_v18, %v175_v19  ;;  %p812_p11 = scmp.ne.s32.totalorder (!%p125_p9), %s992_s6, %s811_s16 }
  0x14   : > { %p813_p12 = pnand (!%p125_p9), %p812_p11, %p932_p5 }
  0x15   : > { %s151_s21 = scalar_select %p150_p10, %s915_s13, 1 }
  0x16   : > { %s997_s13 = scalar_lea.sflag [#allocation3], %s147_s30  ;;  %p814_p13 = pneg %p813_p12 }
  0x17   : > { %s697_s22 = sshll.u32 %s151_s21, 6  ;;  %s675_s23 = sshll.u32 %s151_s21, 2 }
  0x18   : > { %s154_s26 = scalar_lea.vmem %s1038_s0, %s697_s22  ;;  %s158_s29 = scalar_lea.vmem %s1039_s1, %s675_s23 }
  0x19   : > { %v159_v1 = vld [vmem:[%s154_s26] sm:$0xff]  ;;  %v160_v2 = vld [vmem:[%s154_s26 + $0x8] sm:$0xff]  ;;  %v161_v6 = vld [vmem:[%s154_s26 + $0x10] sm:$0xff]  ;;  %s815_s21 = sshll.u32 %s876_s17, 4  ;;  %s816_s21 = int_to_ptr.vmem [resolvable:$false] %s815_s21 }
  0x1a   : > { %v167_v3 = vld [vmem:[%s158_s29] sm:$0xf]  ;;  %v743_v5 = vpack.c.bf16 %v160_v2, %v159_v1  ;;  %v162_v7 = vld [vmem:[%s154_s26 + $0x18] sm:$0xff]  ;;  %v164_v13 = vld [vmem:[%s154_s26 + $0x28] sm:$0xff]  ;;  %s817_s22 = scalar_lea.vmem %s816_s21, 2048  ;;  %p818_p0 = scmp.lt.s32.totalorder %s992_s6, %s816_s21 }
  0x1b   : > { %v168_v4 = vmul.f32 1.442695, %v167_v3  ;;  %v163_v8 = vld [vmem:[%s154_s26 + $0x20] sm:$0xff]  ;;  %v749_v12 = vpack.c.bf16 %v162_v7, %v161_v6  ;;  %v165_v14 = vld [vmem:[%s154_s26 + $0x30] sm:$0xff]  ;;  %v166_v15 = vld [vmem:[%s154_s26 + $0x38] sm:$0xff]  ;;  %p819_p1 = scmp.lt.s32.totalorder %s817_s22, %s811_s16 }
  0x1c   : > { %745 = vmatprep.subr.msk.bf16.mxu0 %vm952_vm1, %v743_v5  ;;  %v755_v16 = vpack.c.bf16 %v164_v13, %v163_v8  ;;  %v761_v17 = vpack.c.bf16 %v166_v15, %v165_v14 }
  0x1d   : > { %809 = vpow2.f32 %v168_v4  ;;  %748 = vmatpush3.bf16.xpose.msk.msra.mxu0 %vm952_vm1, %v743_v5  ;;  %751 = vmatprep.subr.msk.bf16.mxu1 %vm952_vm1, %v749_v12  ;;  %p820_p2 = por %p819_p1, %p818_p0 }
  0x1e   : > { %754 = vmatpush3.bf16.xpose.msk.msra.mxu1 %vm952_vm1, %v749_v12  ;;  %757 = vmatprep.subr.msk.bf16.mxu0 %vm952_vm1, %v755_v16 }
  0x1f   : > { %763 = vmatprep.subr.msk.bf16.mxu1 %vm952_vm1, %v761_v17  ;;  %p821_p3 = pnand %p820_p2, %p814_p13 }
  0x27   : > { %v810_v21 = vpop.eup %809 }
  0x28   : > { %v177_v22 = vrot.slane %v810_v21, %v176_v20 }
  0x2a   : > { %v185_v24 = vrot.slane %v177_v22, %v176_v20  ;;  %v178_v25 = vcombine.high %v177_v22, %v177_v22 }
  0x2c   : > { %v193_v26 = vcombine.high %v185_v24, %v185_v24  ;;  %v198_v27 = vrot.slane %v185_v24, %v197_v23  ;;  %v192_v28 = vrot.slane %v178_v25, %v176_v20 }
  0x2e   : > { %v216_v29 = vmul.f32 %v198_v27, %v160_v2  ;;  %v194_v30 = vcombine.high %v192_v28, %v192_v28  ;;  %v202_v31 = vrot.slane %v192_v28, %v197_v23  ;;  %v215_v32 = vmul.f32 %v198_v27, %v159_v1 }
  0x2f   : > { %v206_v33 = vrot.slane %v193_v26, %v197_v23 }
  0x30   : > { %v218_v34 = vmul.f32 %v202_v31, %v162_v7  ;;  %719 = vmatprep.mubr.msk.f32.mxu0 %vm223_vm0, %v215_v32  ;;  %v217_v35 = vmul.f32 %v202_v31, %v161_v6  ;;  %v210_v36 = vrot.slane %v194_v30, %v197_v23 }
  0x31   : > { %720 = vmatmul.mubr.msk.f32.vlgmr.msra.gmra.mrb[0].mxu0 %vm223_vm0, %v216_v29  ;;  %v219_v37 = vmul.f32 %v206_v33, %v163_v8  ;;  %v220_v39 = vmul.f32 %v206_v33, %v164_v13 }
  0x32   : > { %726 = vmatprep.mubr.msk.f32.mxu1 %vm223_vm0, %v217_v35  ;;  %760 = vmatpush3.bf16.xpose.msk.msra.mxu0 %vm952_vm1, %v755_v16  ;;  %v221_v38 = vmul.f32 %v210_v36, %v165_v14  ;;  %v222_v40 = vmul.f32 %v210_v36, %v166_v15 }
  0x33   : > { %727 = vmatmul.mubr.msk.f32.vlgmr.msra.gmra.mrb[0].mxu1 %vm223_vm0, %v218_v34  ;;  %733 = vmatprep.mubr.msk.f32.mxu0 %vm223_vm0, %v219_v37 }
  0x34   : > { %766 = vmatpush3.bf16.xpose.msk.msra.mxu1 %vm952_vm1, %v761_v17  ;;  %740 = vmatprep.mubr.msk.f32.mxu1 %vm223_vm0, %v221_v38 }
  0x39   : > { %734 = vmatmul.mubr.msk.f32.vlgmr.msra.gmra.mrb[2].mxu0 %vm223_vm0, %v220_v39 }
  0x3b   : > { %741 = vmatmul.mubr.msk.f32.vlgmr.msra.gmra.mrb[2].mxu1 %vm223_vm0, %v222_v40 }
 0x104   : > { %v721_v41 = vpop.f32.mrb[0].mxu0 }
 0x105   : > { %573 = vst.msk [vmem:[%s149_s4 + $0x8] sm:$0xff] %vm223_vm0, %v721_v41  ;;  %v302_v42 = vpop.f32.mrb[1].mxu0 }
 0x106   : > { %572 = vst.msk [vmem:[%s149_s4] sm:$0xff] %vm223_vm0, %v302_v42  ;;  %v728_v43 = vpop.f32.mrb[0].mxu1 }
 0x107   : > { %575 = vst.msk [vmem:[%s149_s4 + $0x18] sm:$0xff] %vm223_vm0, %v728_v43  ;;  %v389_v44 = vpop.f32.mrb[1].mxu1 }
 0x108   : > { %574 = vst.msk [vmem:[%s149_s4 + $0x10] sm:$0xff] %vm223_vm0, %v389_v44 }
 0x10c   : > { %v735_v45 = vpop.f32.mrb[2].mxu0 }
 0x10d   : > { %577 = vst.msk [vmem:[%s149_s4 + $0x28] sm:$0xff] %vm223_vm0, %v735_v45  ;;  %v476_v46 = vpop.f32.mrb[3].mxu0 }
 0x10e   : > { %576 = vst.msk [vmem:[%s149_s4 + $0x20] sm:$0xff] %vm223_vm0, %v476_v46  ;;  %v742_v47 = vpop.f32.mrb[2].mxu1 }
 0x10f   : > { %579 = vst.msk [vmem:[%s149_s4 + $0x38] sm:$0xff] %vm223_vm0, %v742_v47  ;;  %v563_v48 = vpop.f32.mrb[3].mxu1 }
 0x110   : > { %578 = vst.msk [vmem:[%s149_s4 + $0x30] sm:$0xff] %vm223_vm0, %v563_v48 }
 0x111   : > { %824 = shalt.err (!%p821_p3)
}
 0x112   : > { %s825_s23 = scalar_lea.hbm %s990_s14, 1024  ;;  %s829_s26 = scalar_lea.hbm %s1040_s2, 2048 }
 0x113   : > { %p826_p4 = scmp.ne.s32.totalorder %s990_s14, %s825_s23  ;;  %p830_p9 = scmp.lt.u32.totalorder %s990_s14, %s1040_s2 }
 0x114   : > { %p831_p10 = scmp.lt.u32.totalorder %s829_s26, %s825_s23  ;;  %p833_p12 = scmp.lt.u32.totalorder %s825_s23, %s990_s14 }
 0x115   : > { %p827_p7 = pnand %p826_p4, %p932_p5 }
 0x116   : > { %p832_p11 = por %p831_p10, %p830_p9 }
 0x117   : > { %p828_p8 = pneg %p827_p7 }
 0x118   : > { %p834_p13 = por %p833_p12, %p832_p11 }
 0x11a   : > { %p835_p0 = pnand %p834_p13, %p828_p8 }
 0x11c   : > { %838 = shalt.err (!%p835_p0)
}
 0x11d   : > { %s877_s29 = smov 128   ;;  %s878_s30 = smov 8  }
 0x11e   : > { %767 = dma.vmem_to_hbm [thread:$0]  (%p932_p5), %s992_s6, 1024, %s990_s14, %s997_s13, %s877_s29, %s877_s29, %s878_s30  }
 0x11f PF: > { %p773_p1 = scmp.ge.s32.totalorder %s873_s12, 2  ;;  %s609_s3 = sand.u32 1, %s861_s9  }
 0x120   : > { %s610_s4 = scalar_lea.sflag [#allocation3], %s609_s3 }
 0x121   : > { %p770_p2 = pnand %p773_p1, %p936_p6 }
 0x123   : > { %856 = dma.done.wait (!%p770_p2), %s610_s4, 1024  }
 0x124   : > { %858 = vsyncadd (!%p770_p2), %s610_s4, 4294966272  ;;  %p12_p3 = scmp.ge.s32.totalorder %s919_s15, 4   ;;  %s1045_s9 = smov %s865_s10 }
 0x125   : > { %s1046_s10 = smov %s869_s11  ;;  %s1047_s11 = smov %s930_s18 }
 0x126   : > { %s1048_s12 = smov %s919_s15  ;;  %14 = sbr.rel (!%p12_p3) target bundleno = 3 (0x3), region = 66 }
 0x12d   :  { %615 = vsyncpa [#allocation3], 1 }
 0x12e   :  { %617 = vsyncpa [#allocation3 + $0x1], 1 }

</bundles_post_ra>
